<compile_context>
chip_gen: v7x
topology: tpu7x:2x2x1
jax: 0.10.0
libtpu: 0.0.40
codegen_flags: <defaults>
</compile_context>

<pallas_src>
import numpy as np

import jax
import jax.numpy as jnp
from jax.experimental import pallas as pl
from jax.experimental.pallas import tpu as pltpu


# --------------------------------------------------------------------------
# VMEM / tiling helpers (generation-aware, padded-footprint accounting)
# --------------------------------------------------------------------------
def _round_up(x, m):
    return ((x + m - 1) // m) * m


def _tpu_vmem_bytes():
    """Physical per-core VMEM: 64 MiB on v7x, 128 MiB on v5e/v6e."""
    try:
        info = pltpu.get_tpu_info()
        for name in ("vmem_capacity_bytes", "vmem_size_bytes", "vmem_bytes"):
            v = getattr(info, name, None)
            if v:
                return int(v)
    except Exception:
        pass
    return 64 << 20  # conservative default: assume v7x-class VMEM


def _pad_sublanes(c, dtype):
    """Channel (sublane) dim as laid out in VMEM: f32 -> multiple of 8,
    bf16 -> 16, int8/fp8 -> 32."""
    itemsize = np.dtype(dtype).itemsize
    mult = 8 * max(1, 4 // itemsize)
    return _round_up(max(int(c), 1), mult)


def _per_lane_bytes(blocks):
    """Padded VMEM bytes per lane column for one pipeline step, including the
    default double buffering of every BlockSpec.  `blocks` = [(C, dtype), ...]
    over inputs *and* outputs.  C<8 sources (zenith, orography) pay 8x-16x
    sublane padding in VMEM; it is accounted for here rather than silently
    under-provisioning vmem_limit_bytes."""
    total = 0
    for c, dt in blocks:
        total += _pad_sublanes(c, dt) * np.dtype(dt).itemsize
    return 2 * total


def _footprint_budget(physical_vmem):
    # Leave headroom for Mosaic internal scratch / semaphores:
    #   v7x (64 MiB physical)      -> ~48 MiB of pipelined block buffers
    #   v5e/v6e (128 MiB physical) -> ~96 MiB
    return min(int(physical_vmem * 0.75), 96 << 20)


def _pick_lane_tile(L, per_lane_bytes, batch):
    """Largest lane tile (multiple of 128) whose padded double-buffered
    footprint fits the generation-aware budget, additionally shrunk (floor 128)
    so small-batch calls still produce enough grid steps to feed both v7x
    TensorCores and the software pipeline."""
    if L <= 128:
        return L  # single full-extent lane block
    budget = _footprint_budget(_tpu_vmem_bytes())
    # TODO(synk): for extreme channel counts whose footprint exceeds the budget
    # even at Lt=128, split the channel axis into a third grid dimension.
    lt = max(128, (budget // max(per_lane_bytes, 1) // 128) * 128)
    lt = min(lt, _round_up(L, 128))
    # Aim for >= ~8 total grid steps (megacore sharding + pipeline warm-up
    # amortization) when the batch axis alone does not provide them.
    lane_steps = max(2, -(-8 // max(int(batch), 1)))
    lt = min(lt, max(128, _round_up(-(-L // lane_steps), 128)))
    return lt


def _vmem_limit(per_lane_bytes, lane_tile):
    physical = _tpu_vmem_bytes()
    footprint = per_lane_bytes * lane_tile
    return int(min(max(footprint + (4 << 20), 16 << 20), int(physical * 0.8)))


# --------------------------------------------------------------------------
# Init-time orography standardization (runs once; plain jnp per perf review)
# --------------------------------------------------------------------------
def standardize(x):
    """(x - mean) / (std + 1e-6); torch.std() default is unbiased (N-1)."""
    x = x.astype(jnp.float32)
    return (x - jnp.mean(x)) / (jnp.std(x, ddof=1) + 1e-6)


# --------------------------------------------------------------------------
# Kernel 1: dtype cast (used only when tar / tzen are not already float32)
# --------------------------------------------------------------------------
def _cast_kernel(x_ref, o_ref):
    o_ref[...] = x_ref[...].astype(jnp.float32)


def cast_to_f32(x):
    """(B, C, H, W) -> float32 via a lane-dense tiled copy kernel.
    Pure pass-through (no kernel, no copy) when already float32."""
    if x is None or x.dtype == jnp.float32:
        return x
    B, C, H, W = (int(s) for s in x.shape)
    L = H * W
    per_lane = _per_lane_bytes([(C, x.dtype), (C, jnp.float32)])
    Lt = _pick_lane_tile(L, per_lane, B)
    out = pl.pallas_call(
        _cast_kernel,
        out_shape=jax.ShapeDtypeStruct((B, C, L), jnp.float32),
        grid=(B, pl.cdiv(L, Lt)),
        in_specs=[pl.BlockSpec((1, C, Lt), lambda b, l: (b, 0, l))],
        out_specs=pl.BlockSpec((1, C, Lt), lambda b, l: (b, 0, l)),
        compiler_params=pltpu.CompilerParams(
            dimension_semantics=("parallel", "parallel"),
            vmem_limit_bytes=_vmem_limit(per_lane, Lt)),
    )(x.reshape(B, C, L))
    return out.reshape(B, C, H, W)


# --------------------------------------------------------------------------
# Kernel 2: cast + channel concatenation (forward hot path)
# --------------------------------------------------------------------------
def _concat_cast_kernel(*refs):
    """refs = (*src_refs, out_ref): copy each source's channels into its slab.
    Channel counts/offsets are static; the lane dim is full block width
    (unmasked vst) except the ragged last grid step, which Pallas masks on
    writeback.  Source order puts the multi-channel inp first so its channel
    offset is 0 (helps v5e's single vst slot; low priority per review)."""
    out_ref = refs[-1]
    off = 0
    for r in refs[:-1]:
        c = r.shape[1]
        out_ref[:, off:off + c, :] = r[...].astype(jnp.float32)
        off += c


def concat_channels_f32(sources):
    """Cast each (Bi, Ci, H, W) source to float32 and concat along channels.

    Batch-1 sources (static_features) are broadcast over the batch grid axis
    via their index_map.  NOTE: a literal torch.cat requires matching batch
    dims; this matches applying the static features to every sample.
    """
    B = max(int(s.shape[0]) for s in sources)
    H, W = int(sources[0].shape[2]), int(sources[0].shape[3])
    L = H * W
    Cout = sum(int(s.shape[1]) for s in sources)

    per_lane = _per_lane_bytes([(int(s.shape[1]), s.dtype) for s in sources]
                               + [(Cout, jnp.float32)])
    Lt = _pick_lane_tile(L, per_lane, B)

    in_specs, flat = [], []
    for s in sources:
        c = int(s.shape[1])
        bcast = int(s.shape[0]) == 1 and B > 1
        idx_map = (lambda b, l: (0, 0, l)) if bcast else (lambda b, l: (b, 0, l))
        in_specs.append(pl.BlockSpec((1, c, Lt), idx_map))
        flat.append(s.reshape(int(s.shape[0]), c, L))

    out = pl.pallas_call(
        _concat_cast_kernel,
        out_shape=jax.ShapeDtypeStruct((B, Cout, L), jnp.float32),
        grid=(B, pl.cdiv(L, Lt)),
        in_specs=in_specs,
        out_specs=pl.BlockSpec((1, Cout, Lt), lambda b, l: (b, 0, l)),
        compiler_params=pltpu.CompilerParams(
            dimension_semantics=("parallel", "parallel"),
            vmem_limit_bytes=_vmem_limit(per_lane, Lt)),
    )(*flat)
    return out.reshape(B, Cout, H, W)


# --------------------------------------------------------------------------
# PreProcessor equivalent
# --------------------------------------------------------------------------
class PreProcessorPallas:
    # TODO(synk): file-based conditioning loaders (get_land_mask/get_orography)
    # and .to(device) have no Pallas equivalent; conditioning arrays are passed
    # in directly and device placement is left to JAX.
    def __init__(self, img_size, *, add_zenith, add_landmask, add_orography,
                 landmask=None, orography=None):
        imgx, imgy = img_size
        self.add_zenith = add_zenith
        static = None
        if add_landmask:
            # torch.nn.functional.one_hot infers num_classes = max + 1
            k = int(jnp.max(landmask)) + 1
            lsm = jax.nn.one_hot(landmask, k, dtype=jnp.float32)      # (H, W, K)
            lsm = jnp.transpose(lsm, (2, 0, 1))[None]                 # (1, K, H, W)
            lsm = lsm[:, :, :imgx, :imgy]
            static = lsm if static is None else jnp.concatenate([static, lsm], axis=1)
        if add_orography:
            oro = orography.astype(jnp.float32)[:imgx, :imgy]
            oro = standardize(oro)[None, None]                        # init-time, plain jnp
            static = oro if static is None else jnp.concatenate([static, oro], axis=1)
        self.do_add_static_features = static is not None
        self.static_features = static

    def __call__(self, data):
        if self.add_zenith:
            inp, tar, izen, tzen = data
        else:
            inp, tar = data
            izen = tzen = None

        sources = [inp]
        if self.add_zenith:
            sources.append(izen)
        if self.do_add_static_features:
            sources.append(self.static_features)

        if len(sources) == 1:
            out_inp = cast_to_f32(inp)          # pass-through if already f32
        else:
            out_inp = concat_channels_f32(sources)

        # tar / tzen are pass-throughs when already float32: no kernel, no copy.
        out_tar = cast_to_f32(tar)
        out_tzen = cast_to_f32(tzen) if self.add_zenith else None
        return out_inp, out_tar, out_tzen


# --------------------------------------------------------------------------
# Demo / self-check
# --------------------------------------------------------------------------
if __name__ == "__main__":
    key = jax.random.PRNGKey(0)
    kx, kt, kiz, ktz, klm, koro, kr1, kr2 = jax.random.split(key, 8)

    B, C, H, W = 2, 4, 16, 16
    img_size = (H, W)

    inp = jax.random.normal(kx, (B, C, H, W), dtype=jnp.float32)
    tar = jax.random.normal(kt, (B, C, H, W), dtype=jnp.float32)
    izen = jax.random.normal(kiz, (B, 1, H, W), dtype=jnp.float32)
    tzen = jax.random.normal(ktz, (B, 1, H, W), dtype=jnp.float32)

    # deterministic synthetic conditioning inputs (stand-ins for file loads)
    landmask = jax.random.randint(klm, (H, W), 0, 2)                  # values {0,1}
    orography = jax.random.normal(koro, (H, W), dtype=jnp.float32) * 500.0 + 1000.0

    pp = PreProcessorPallas(img_size, add_zenith=True, add_landmask=True,
                            add_orography=True, landmask=landmask,
                            orography=orography)

    # f32 inputs: hot path = concat kernel only; tar/tzen pass straight through
    out_inp, out_tar, out_tzen = pp((inp, tar, izen, tzen))
    jax.block_until_ready((out_inp, out_tar, out_tzen))

    # bf16 inputs: exercises the real-cast path through both kernels
    out_inp16, out_tar16, out_tzen16 = pp((inp.astype(jnp.bfloat16),
                                           tar.astype(jnp.bfloat16),
                                           izen.astype(jnp.bfloat16),
                                           tzen.astype(jnp.bfloat16)))
    jax.block_until_ready((out_inp16, out_tar16, out_tzen16))

    # Ragged lane axis (H*W = 192, not a multiple of 128) exercises the
    # masked-tail grid path of the concat kernel with mixed dtypes.
    Hr, Wr = 16, 12
    a_r = jax.random.normal(kr1, (B, 3, Hr, Wr), dtype=jnp.float32)
    b_r = jax.random.normal(kr2, (B, 1, Hr, Wr), dtype=jnp.bfloat16)
    out_r = concat_channels_f32([a_r, b_r])
    jax.block_until_ready(out_r)
    ref_r = jnp.concatenate([a_r, b_r.astype(jnp.float32)], axis=1)
    assert out_r.shape == (B, 4, Hr, Wr)
    assert out_r.dtype == jnp.float32
    assert jnp.allclose(out_r, ref_r, atol=1e-6)

    # pure-JAX reference for the full forward
    oro_c = orography[:H, :W]
    oro_ref = (oro_c - jnp.mean(oro_c)) / (jnp.std(oro_c, ddof=1) + 1e-6)
    lsm_ref = jnp.transpose(jax.nn.one_hot(landmask, 2, dtype=jnp.float32), (2, 0, 1))[None]
    static_ref = jnp.concatenate([lsm_ref, oro_ref[None, None]], axis=1)
    static_b = jnp.broadcast_to(static_ref, (B,) + static_ref.shape[1:])
    inp_ref = jnp.concatenate([inp, izen, static_b], axis=1)

    assert out_inp.shape == (B, C + 1 + 2 + 1, H, W)
    assert out_inp.dtype == jnp.float32
    assert jnp.allclose(out_inp, inp_ref, atol=1e-5)
    assert jnp.allclose(out_tar, tar)
    assert jnp.allclose(out_tzen, tzen)

    assert out_inp16.dtype == jnp.float32
    assert out_tar16.dtype == jnp.float32 and out_tzen16.dtype == jnp.float32
    assert jnp.allclose(out_inp16, inp_ref, atol=5e-2)
    assert jnp.allclose(out_tar16, tar, atol=5e-2)
    assert jnp.allclose(out_tzen16, tzen, atol=5e-2)

    print("KERNEL_OK")
</pallas_src>

<mosaic_0001>
module attributes {stable_mosaic.version = 11 : i64} {
  func.func @_concat_cast_kernel(%arg0: i32, %arg1: i32, %arg2: memref<1x4x128xf32, #tpu.memory_space<vmem>>, %arg3: memref<1x1x128xf32, #tpu.memory_space<vmem>>, %arg4: memref<1x3x128xf32, #tpu.memory_space<vmem>>, %arg5: memref<1x8x128xf32, #tpu.memory_space<vmem>>) attributes {dimension_semantics = [#tpu.dimension_semantics<parallel>, #tpu.dimension_semantics<parallel>], iteration_bounds = array<i64: 2, 2>, scalar_prefetch = 0 : i64, scratch_operands = 0 : i64, tpu.core_type = #tpu.core_type<tc>, window_params = [{transform_indices = @transform_0, window_bounds = array<i64: 1, 4, 128>}, {transform_indices = @transform_1, window_bounds = array<i64: 1, 1, 128>}, {transform_indices = @transform_2, window_bounds = array<i64: 1, 3, 128>}, {transform_indices = @transform_3, window_bounds = array<i64: 1, 8, 128>}]} {
    %c0 = arith.constant 0 : index
    %c0_0 = arith.constant 0 : index
    %c0_1 = arith.constant 0 : index
    %0 = vector.load %arg2[%c0, %c0_0, %c0_1] : memref<1x4x128xf32, #tpu.memory_space<vmem>>, vector<1x4x128xf32>
    %c0_2 = arith.constant 0 : index
    %c0_3 = arith.constant 0 : index
    %c0_4 = arith.constant 0 : index
    %1 = vector.load %arg5[%c0_2, %c0_3, %c0_4] : memref<1x8x128xf32, #tpu.memory_space<vmem>>, vector<1x4x128xf32>
    tpu.vector_store %arg5[%c0_2, %c0_3, %c0_4], %0 {strides = array<i32>} : memref<1x8x128xf32, #tpu.memory_space<vmem>>, vector<1x4x128xf32>,
    %c0_5 = arith.constant 0 : index
    %c0_6 = arith.constant 0 : index
    %c0_7 = arith.constant 0 : index
    %2 = vector.load %arg3[%c0_5, %c0_6, %c0_7] : memref<1x1x128xf32, #tpu.memory_space<vmem>>, vector<1x1x128xf32>
    %c0_8 = arith.constant 0 : index
    %c4 = arith.constant 4 : index
    %c0_9 = arith.constant 0 : index
    %3 = vector.load %arg5[%c0_8, %c4, %c0_9] : memref<1x8x128xf32, #tpu.memory_space<vmem>>, vector<1x1x128xf32>
    tpu.vector_store %arg5[%c0_8, %c4, %c0_9], %2 {strides = array<i32>} : memref<1x8x128xf32, #tpu.memory_space<vmem>>, vector<1x1x128xf32>,
    %c0_10 = arith.constant 0 : index
    %c0_11 = arith.constant 0 : index
    %c0_12 = arith.constant 0 : index
    %4 = vector.load %arg4[%c0_10, %c0_11, %c0_12] : memref<1x3x128xf32, #tpu.memory_space<vmem>>, vector<1x3x128xf32>
    %c0_13 = arith.constant 0 : index
    %c5 = arith.constant 5 : index
    %c0_14 = arith.constant 0 : index
    %5 = vector.load %arg5[%c0_13, %c5, %c0_14] : memref<1x8x128xf32, #tpu.memory_space<vmem>>, vector<1x3x128xf32>
    tpu.vector_store %arg5[%c0_13, %c5, %c0_14], %4 {strides = array<i32>} : memref<1x8x128xf32, #tpu.memory_space<vmem>>, vector<1x3x128xf32>,
    return
  }
  func.func @transform_0(%arg0: i32, %arg1: i32) -> (i32, i32, i32) {
    %c0_i32 = arith.constant 0 : i32
    %c0_i32_0 = arith.constant 0 : i32
    return %arg0, %c0_i32, %arg1 : i32, i32, i32
  }
  func.func @transform_1(%arg0: i32, %arg1: i32) -> (i32, i32, i32) {
    %c0_i32 = arith.constant 0 : i32
    %c0_i32_0 = arith.constant 0 : i32
    return %arg0, %c0_i32, %arg1 : i32, i32, i32
  }
  func.func @transform_2(%arg0: i32, %arg1: i32) -> (i32, i32, i32) {
    %c0_i32 = arith.constant 0 : i32
    %c0_i32_0 = arith.constant 0 : i32
    %c0_i32_1 = arith.constant 0 : i32
    return %c0_i32, %c0_i32_0, %arg1 : i32, i32, i32
  }
  func.func @transform_3(%arg0: i32, %arg1: i32) -> (i32, i32, i32) {
    %c0_i32 = arith.constant 0 : i32
    %c0_i32_0 = arith.constant 0 : i32
    return %arg0, %c0_i32, %arg1 : i32, i32, i32
  }
}

</mosaic_0001>

<bundles_post_ra>
// kernel: tpu_custom_call.1
= control target key start
LH: loop header
LB: loop body
LE: loop exit
PB: predicated region body
PF: predicated region fallthrough
CT: control target
= control target key end

     0   :  { %s828_s0 = inlined_call_operand.hbm [shape: f32[2,4,256], index: 0, kind: input, shape index: {}]   ;;  %s829_s1 = inlined_call_operand.vmem [shape: f32[2,1,256], index: 1, kind: input, shape index: {}]   ;;  %s830_s2 = inlined_call_operand.vmem [shape: f32[1,3,256], index: 2, kind: input, shape index: {}]   ;;  %s831_s3 = inlined_call_operand.hbm [shape: f32[2,8,256], index: 3, kind: output, shape index: {}]  }
   0x1   :  { %835 = sst [smem:[#allocation10_spill]] %s828_s0 }
   0x2   :  { %8 = vsyncpa [#allocation3], 0 }
   0x3   :  { %10 = vsyncpa [#allocation3 + $0x1], 0 }
   0x4   :  { %11 = vsyncpa [#allocation4], 0 }
   0x5   :  { %13 = vsyncpa [#allocation4 + $0x1], 0  ;;  %s630_s12 = smov 0   ;;  %s632_s13 = smov 0  }
   0x6   :  { %s634_s14 = smov 0   ;;  %s636_s15 = smov 0  }
   0x7   :  { %s638_s16 = smov 0   ;;  %s640_s17 = smov 0  }
   0x8   :  { %s642_s18 = smov 0   ;;  %s644_s19 = smov 0  }
   0x9 LB: > { %s383_s20 = sadd.s32 4294967295, %s606_s19   ;;  %s384_s21 = sadd.s32 4294967294, %s606_s19   ;;  %s606_s19 = sphi %s644_s19, %s19_s19   ;;  %s602_s18 = sphi %s642_s18, %s856_s18   ;;  %s598_s17 = sphi %s640_s17, %s855_s17   ;;  %s594_s16 = sphi %s638_s16, %s854_s16   ;;  %s590_s15 = sphi %s636_s15, %s853_s15   ;;  %s586_s14 = sphi %s634_s14, %s852_s14   ;;  %s582_s13 = sphi %s632_s13, %s851_s13   ;;  %s578_s12 = sphi %s630_s12, %s850_s12  }
   0xa   : > { %s28_s22 = sadd.s32 1, %s598_s17  ;;  %s31_s23 = sadd.s32 1, %s602_s18 }
   0xb   : > { %p29_p0 = scmp.ge.s32.totalorder %s28_s22, 2  ;;  %s40_s24 = sadd.s32 1, %s586_s14 }
   0xc   : > { %p47_p1 = scmp.ne.s32.totalorder %s586_s14, %s582_s13  ;;  %p48_p2 = scmp.eq.s32.totalorder %s606_s19, 0 }
   0xd   : > { %s858_s22 = smov (%p29_p0, %s28_s22), 0  ;;  %s860_s23 = smov (!%p29_p0, %s31_s23), %s602_s18 }
   0xe   : > { %836 = sst [smem:[#allocation8_spill]] %s858_s22  ;;  %s36_s25 = ssub.s32 %s598_s17, %s858_s22 }
   0xf   : > { %p683_p3 = por %p48_p2, %p47_p1  ;;  %p33_p4 = scmp.ge.s32.totalorder %s860_s23, 2 }
  0x10   : > { %p53_p5 = scmp.ne.s32.totalorder %s582_s13, %s578_s12  ;;  %p54_p6 = scmp.eq.s32.totalorder %s383_s20, 0 }
  0x11   : > { %p133_p7 = scmp.eq.s32.totalorder %s383_s20, 3  ;;  %s862_s23 = smov (%p33_p4, %s860_s23), 0 }
  0x12   : > { %838 = sst [smem:[#allocation9_spill]] %s862_s23  ;;  %p691_p8 = por %p54_p6, %p53_p5 }
  0x13   : > { %p695_p9 = por %p133_p7, %p47_p1  ;;  %s35_s29 = ssub.s32 %s602_s18, %s862_s23 }
  0x14   : > { %p139_p10 = scmp.eq.s32.totalorder %s384_s21, 3  ;;  %s37_s30 = sor.u32 %s36_s25, %s35_s29 }
  0x15   : > { %s840_s28 = scalar_select %p695_p9, 1, 0 }
  0x16   : > { %p38_p11 = scmp.eq.s32.totalorder %s37_s30, 0  ;;  %p701_p12 = por %p139_p10, %p53_p5 }
  0x17   : > { %p412_p13 = scmp.lt.s32.totalorder %s606_s19, 4  ;;  %s159_s5 = sand.u32 1, %s586_s14  }
  0x18   : > { %s841_s4 = scalar_select %p701_p12, 1, 0 }
  0x19   : > { %s708_s6 = scalar_select %p38_p11, %s586_s14, %s40_s24  }
  0x1a   : > { %s387_s7 = sshll.u32 %s159_s5, 2  ;;  %s388_s8 = sshll.u32 %s602_s18, 1 }
  0x1b   : > { %s168_s9 = sadd.s32 %s598_s17, %s388_s8  ;;  %s163_s10 = scalar_lea.vmem [#allocation2], %s387_s7 }
  0x1c   : > { %s172_s11 = sshll.u32 %s163_s10, 4  ;;  %s389_s20 = sshll.u32 %s168_s9, 6  ;;  %s712_s11 = int_to_ptr.vmem [resolvable:$true] %s172_s11 }
  0x1d   : > { %s842_s0 = sld [smem:[#allocation10_spill]]  ;;  %p721_p0 = pnand %p412_p13, %p683_p3 }
  0x1e   : > { %s160_s30 = scalar_lea.sflag [#allocation3], %s159_s5 }
  0x1f   : > { %p480_p5 = pneg %p721_p0 }
  0x23   : > { %s717_s29 = scalar_lea.hbm %s842_s0, %s389_s20  ;;  %s483_s9 = scalar_lea.hbm %s842_s0, 256 }
  0x24   : > { %s478_s7 = scalar_lea.hbm %s717_s29, 64  ;;  %p484_p3 = scmp.lt.u32.totalorder %s717_s29, %s842_s0 }
  0x25   : > { %p479_p4 = scmp.ne.s32.totalorder %s717_s29, %s478_s7  ;;  %p485_p10 = scmp.lt.u32.totalorder %s483_s9, %s478_s7 }
  0x26   : > { %p487_p13 = scmp.lt.u32.totalorder %s478_s7, %s717_s29 }
  0x27   : > { %p481_p6 = pnand %p480_p5, %p479_p4  ;;  %p486_p11 = por %p485_p10, %p484_p3 }
  0x29   : > { %p482_p7 = pneg %p481_p6  ;;  %p488_p1 = por %p487_p13, %p486_p11 }
  0x2b   : > { %p489_p2 = pnand %p488_p1, %p482_p7 }
  0x2d   : > { %492 = shalt.err (!%p489_p2)
}
  0x2e   : > { %s493_s5 = scalar_lea.vmem %s712_s11, 64  ;;  %s608_s21 = smov [#allocation2]  }
  0x2f   : > { %p494_p4 = scmp.ne.s32.totalorder %s712_s11, %s493_s5  ;;  %s498_s25 = sshll.u32 %s608_s21, 4  ;;  %s499_s25 = int_to_ptr.vmem [resolvable:$false] %s498_s25 }
  0x30   : > { %s500_s26 = scalar_lea.vmem %s499_s25, 128  ;;  %p501_p9 = scmp.lt.s32.totalorder %s712_s11, %s499_s25 }
  0x31   : > { %p496_p6 = pnand %p494_p4, %p480_p5  ;;  %p502_p3 = scmp.lt.s32.totalorder %s500_s26, %s493_s5 }
  0x33   : > { %p497_p12 = pneg %p496_p6  ;;  %p503_p10 = por %p502_p3, %p501_p9 }
  0x35   : > { %p504_p11 = pnand %p503_p10, %p497_p12 }
  0x37   : > { %507 = shalt.err (!%p504_p11)
}
  0x38   : > { %407 = dma.hbm_to_vmem [thread:$0]  (!%p721_p0), %s717_s29, 64, %s712_s11, %s160_s30  }
  0x39   : > { %p844_p1 = scmp.lt.s32.totalorder %s606_s19, 5  ;;  %p845_p2 = scmp.ge.s32.totalorder %s606_s19, 1 }
  0x3b   : > { %p195_p5 = pnand %p845_p2, %p844_p1 }
  0x3c   : > { %s757_s7 = sand.u32 (!%p195_p5), 1, %s582_s13  }
  0x3d   : > { %198 = sbr.rel (%p195_p5) target bundleno = 101 (0x65), region = 32  ;;  %s391_s8 = sshll.u32 (!%p195_p5), %s757_s7, 2 }
  0x3e   : > { %s201_s9 = scalar_lea.sflag (!%p195_p5), [#allocation3], %s757_s7  ;;  %s204_s10 = scalar_lea.vmem (!%p195_p5), [#allocation2], %s391_s8 }
  0x44   : > { %569 = dma.done.wait (%p691_p8), %s201_s9, 64  }
  0x45   : > { %571 = vsyncadd (%p691_p8), %s201_s9, 4294967232  ;;  %s392_s11 = sshll.u32 %s757_s7, 3  ;;  %p238_p9 = scmp.lt.s32.totalorder %s594_s16, 1  ;;  %v249_v0 = vld [vmem:[%s204_s10] sm:$0xf] }
  0x46   : > { %p240_p12 = scmp.lt.s32.totalorder %s590_s15, 1  ;;  %s237_s29 = scalar_lea.vmem [#allocation5], %s392_s11 }
  0x47   : > { %s271_s24 = sshll.u32 %s237_s29, 4  ;;  %s396_s30 = sshll.u32 %s594_s16, 1  ;;  %250 = vst [vmem:[%s237_s29] sm:$0xf] %v249_v0  ;;  %s768_s24 = int_to_ptr.vmem [resolvable:$true] %s271_s24 }
  0x48   : > { %s864_s16 = smov (!%p238_p9, %s594_s16), 1  ;;  %s267_s5 = sadd.s32 %s590_s15, %s396_s30 }
  0x49   : > { %s241_s20 = scalar_select %p240_p12, %s590_s15, 1 }
  0x4a   : > { %s393_s27 = sshll.u32 %s864_s16, 1  ;;  %s397_s22 = sshll.u32 %s267_s5, 7 }
  0x4b   : > { %s243_s21 = sadd.s32 %s393_s27, %s241_s20  ;;  %s394_s25 = sshll.u32 %s241_s20, 2 }
  0x4c   : > { %s244_s9 = scalar_lea.vmem %s829_s1, %s243_s21  ;;  %s248_s23 = scalar_lea.vmem %s830_s2, %s394_s25 }
  0x4d   : > { %v251_v1 = vld [vmem:[%s244_s9] sm:$0x1]  ;;  %s269_s10 = scalar_lea.hbm %s831_s3, %s397_s22  ;;  %s256_s30 = scalar_lea.sflag [#allocation4], %s757_s7 }
  0x4e   : > { %v253_v2 = vld [vmem:[%s248_s23] sm:$0x7]  ;;  %252 = vst [vmem:[%s237_s29 + $0x4] sm:$0x1] %v251_v1  ;;  %s508_s20 = scalar_lea.vmem %s768_s24, 128  ;;  %p846_p0 = scmp.ne.s32.totalorder %s840_s28, 0 }
  0x4f   : > { %254 = vst [vmem:[%s237_s29 + $0x5] sm:$0x7] %v253_v2  ;;  %p509_p8 = scmp.ne.s32.totalorder %s768_s24, %s508_s20  ;;  %s609_s27 = smov [#allocation5]  }
  0x50   : > { %s512_s21 = sshll.u32 %s609_s27, 4  ;;  %s513_s21 = int_to_ptr.vmem [resolvable:$false] %s512_s21 }
  0x51   : > { %p510_p7 = pnand %p509_p8, %p846_p0  ;;  %s514_s0 = scalar_lea.vmem %s513_s21, 256 }
  0x52   : > { %p515_p4 = scmp.lt.s32.totalorder %s768_s24, %s513_s21  ;;  %p516_p6 = scmp.lt.s32.totalorder %s514_s0, %s508_s20 }
  0x53   : > { %p511_p13 = pneg %p510_p7 }
  0x54   : > { %p517_p3 = por %p516_p6, %p515_p4 }
  0x56   : > { %p518_p10 = pnand %p517_p3, %p511_p13 }
  0x58   : > { %521 = shalt.err (!%p518_p10)
}
  0x59   : > { %s522_s23 = scalar_lea.hbm %s269_s10, 128  ;;  %s526_s29 = scalar_lea.hbm %s831_s3, 512 }
  0x5a   : > { %p523_p11 = scmp.ne.s32.totalorder %s269_s10, %s522_s23  ;;  %p527_p5 = scmp.lt.u32.totalorder %s269_s10, %s831_s3 }
  0x5b   : > { %p528_p9 = scmp.lt.u32.totalorder %s526_s29, %s522_s23  ;;  %p530_p8 = scmp.lt.u32.totalorder %s522_s23, %s269_s10 }
  0x5c   : > { %p524_p1 = pnand %p523_p11, %p846_p0 }
  0x5d   : > { %p529_p12 = por %p528_p9, %p527_p5 }
  0x5e   : > { %p525_p2 = pneg %p524_p1 }
  0x5f   : > { %p531_p7 = por %p530_p8, %p529_p12 }
  0x61   : > { %p532_p13 = pnand %p531_p7, %p525_p2 }
  0x63   : > { %535 = shalt.err (!%p532_p13)
}
  0x64   : > { %402 = dma.vmem_to_hbm [thread:$0]  (%p846_p0), %s768_s24, 128, %s269_s10, %s256_s30  }
  0x65 PF: > { %p413_p4 = scmp.ge.s32.totalorder %s606_s19, 2  ;;  %s283_s26 = sand.u32 1, %s578_s12  }
  0x66   : > { %p847_p6 = scmp.ne.s32.totalorder %s841_s4, 0  ;;  %s284_s8 = scalar_lea.sflag [#allocation4], %s283_s26 }
  0x68   : > { %p409_p3 = pnand %p413_p4, %p847_p6 }
  0x6a   : > { %573 = dma.done.wait (!%p409_p3), %s284_s8, 128  }
  0x6b   : > { %575 = vsyncadd (!%p409_p3), %s284_s8, 4294967168  ;;  %s19_s19 = sadd.s32 1, %s606_s19   ;;  %s848_s28 = sld [smem:[#allocation8_spill]] }
  0x6c   : > { %p16_p10 = scmp.ge.s32.totalorder %s19_s19, 6   ;;  %s849_s24 = sld [smem:[#allocation9_spill]] }
  0x6d   : > { %s850_s12 = smov %s582_s13  ;;  %s851_s13 = smov %s586_s14 }
  0x6e   : > { %s852_s14 = smov %s708_s6  ;;  %s853_s15 = smov %s598_s17 }
  0x6f   : > { %s854_s16 = smov %s602_s18  ;;  %18 = sbr.rel (!%p16_p10) target bundleno = 9 (0x9), region = 83 }
  0x71   : > { %s855_s17 = smov %s848_s28 }
  0x72   : > { %s856_s18 = smov %s849_s24 }
  0x76   :  { %289 = vsyncpa [#allocation3], 1 }
  0x77   :  { %291 = vsyncpa [#allocation3 + $0x1], 1 }
  0x78   :  { %292 = vsyncpa [#allocation4], 1 }
  0x79   :  { %294 = vsyncpa [#allocation4 + $0x1], 1 }

</bundles_post_ra>
